<compile_context>
chip_gen: v7x
topology: tpu7x:2x2x1
jax: 0.10.0
libtpu: 0.0.40
codegen_flags: <defaults>
</compile_context>

<pallas_src>
import numpy as np
import jax
import jax.numpy as jnp
from jax.experimental import pallas as pl
from jax.experimental.pallas import tpu as pltpu


def _round_up(x, m):
    return ((x + m - 1) // m) * m


# ------------------------------ host-side helpers ----------------------------
def get_all_span_ids(sent_len, max_span_len):
    """Same semantics as the PyTorch helper (set of (start, end) pairs)."""
    span_indices = set()
    for i in range(sent_len):
        for k in range(1, max_span_len + 1):
            span_indices.add((i, min(i + k, sent_len)))
    return span_indices


def canonical_span_ids(n_words, n_starts, max_span_len):
    """Span ids in the canonical dense row layout used by the kernel.

    Row r = (k-1)*n_starts + start  <->  span (start, start+k); the row holds a
    real span iff start + k <= n_words[b].
    """
    out = []
    for nb in n_words:
        spans = []
        for k in range(1, max_span_len + 1):
            for s in range(n_starts):
                if s + k <= nb:
                    spans.append(((k - 1) * n_starts + s, (s, s + k)))
        out.append(spans)
    return out


# ----------------------------------- kernel ----------------------------------
def _make_span_ner_kernel(n_starts, seq_pad):
    S, S_SRC = n_starts, seq_pad
    NEG = float(jnp.finfo(jnp.float32).min)   # finite max-pool sentinel (no inf/NaN)

    def kernel(n_words_ref, x_ref, wpool_ref, bpd_ref, bias_ref,
               pooled_ref, scores_ref, shifted, running):
        b = pl.program_id(0)
        kk = pl.program_id(1)                       # span length == kk + 1
        n_b = n_words_ref[b]                        # int32 (SMEM)

        rows = jax.lax.broadcasted_iota(jnp.int32, (S, 1), 0)   # span starts

        @pl.when(kk == 0)
        def _():
            x = x_ref[0]                                        # (S_SRC, D_pad) f32
            rows_src = jax.lax.broadcasted_iota(jnp.int32, (S_SRC, 1), 0)
            xm = jnp.where(rows_src < n_b, x, NEG)              # mask past-sentence rows
            shifted[...] = xm
            running[...] = xm[:S]                               # length-1 windows

        @pl.when(kk > 0)
        def _():
            # Advance the window by one row via a sublane rotation (XLU slot);
            # shifted[i] == xm[i + kk] for all rows we read ([:S]).
            sh = pltpu.roll(shifted[...], shift=S_SRC - 1, axis=0)
            shifted[...] = sh
            running[...] = jnp.maximum(running[...], sh[:S])

        valid = (rows + (kk + 1)) <= n_b                        # (S, 1) bool
        pooled = jnp.where(valid, running[...], 0.0)            # zero padding rows (f32)
        pooled_bf = pooled.astype(jnp.bfloat16)
        pooled_ref[0] = pooled_bf                               # bf16 lane-dense store

        # bf16 x bf16 -> f32 accumulation: single MXU pass.
        sc = jnp.dot(pooled_bf, wpool_ref[...],
                     preferred_element_type=jnp.float32)
        # valid rows: + (bias + delta[k]); padding rows: + bias (pooled == 0, as in
        # the module).  Padding lanes of both rows are -1e30 so argmax can run on
        # the padded scores.
        scores_ref[0] = sc + jnp.where(valid, bpd_ref[0], bias_ref[...])

    return kernel


# --------------------------------- wrapper ------------------------------------
def span_ner_forward(word_encodings, n_words, emb_table, w_linear, b_linear,
                     max_span_len):
    """Forward pass of SpanNERDecoder (pooling='max', dropout=0, use_cls=False).

    Returns (span_pooled, scores, ner_output) in the canonical dense span layout:
    row r = (k-1)*S + start of axis 1 is the span (start, start+k); rows with
    start + k > n_words[b] are padding (zero span_pooled, bias-only scores),
    matching the zero padding rows of the PyTorch module.  span_pooled is bf16
    (max-pooled values, no accumulation); scores are f32.
    """
    B, S0, D = word_encodings.shape
    L = int(max_span_len)
    E = emb_table.shape[1]
    C = w_linear.shape[0]
    C_pad = _round_up(max(C, 1), 128)     # lane-dense score stores
    D_pad = _round_up(D, 128)             # lane-dense pooled stores
    S = _round_up(S0, 16)                 # 16: bf16 sublane tile for the pooled output
    S_SRC = _round_up(S + L, 8)           # padded sequence: rolled window stays in range
    N = L * S                             # canonical span rows per batch element

    f32 = jnp.float32
    bf16 = jnp.bfloat16
    NEG_SCORE = -1e30                     # score padding-lane sentinel (argmax-safe)

    x_pad = jnp.zeros((B, S_SRC, D_pad), f32).at[:, :S0, :D].set(
        word_encodings.astype(f32))
    n_words_arr = jnp.asarray(np.asarray(n_words, dtype=np.int32))

    # Linear(concat([pooled, len_emb])) == pooled @ W_pool + (bias + delta[len])
    w_pool = jnp.zeros((D_pad, C_pad), bf16).at[:D, :C].set(
        w_linear[:, :D].T.astype(bf16))
    bpd_real = (emb_table.astype(f32) @ w_linear[:, D:D + E].T.astype(f32)
                + b_linear.astype(f32)[None, :])                    # (L, C)
    bpd = jnp.full((L, 1, C_pad), NEG_SCORE, f32).at[:, 0, :C].set(bpd_real)
    bias = jnp.full((1, C_pad), NEG_SCORE, f32).at[:, :C].set(b_linear.astype(f32))

    kernel = _make_span_ner_kernel(S, S_SRC)

    # VMEM budget: double-buffered blocks + persistent scratch, with headroom.
    est = (2 * S_SRC * D_pad * 4          # encodings block
           + 2 * D_pad * C_pad * 2        # W_pool (bf16)
           + 2 * (C_pad * 4 + C_pad * 4)  # bias+delta row, bias row
           + 2 * S * D_pad * 2            # pooled out block (bf16)
           + 2 * S * C_pad * 4            # scores out block
           + S_SRC * D_pad * 4 + S * D_pad * 4)   # shifted + running scratch
    vmem_limit = int(min(48 * 1024 * 1024, max(16 * 1024 * 1024, 2 * est)))

    flops = 2 * B * N * D_pad * C_pad + B * N * D_pad        # 1x-pass matmul + maxes
    bytes_accessed = (4 * B * S_SRC * D_pad                  # encodings read
                      + 2 * D_pad * C_pad + 4 * (L + 1) * C_pad
                      + 2 * B * N * D_pad                    # pooled write (bf16)
                      + 4 * B * N * C_pad + 4 * B)           # scores write + n_words

    pooled, scores_pad = pl.pallas_call(
        kernel,
        out_shape=(
            jax.ShapeDtypeStruct((B, N, D_pad), bf16),
            jax.ShapeDtypeStruct((B, N, C_pad), f32),
        ),
        grid_spec=pltpu.PrefetchScalarGridSpec(
            num_scalar_prefetch=1,            # n_words -> SMEM
            grid=(B, L),
            in_specs=[
                # encodings: indexed by b only -> resident across the k axis
                pl.BlockSpec((1, S_SRC, D_pad), lambda b, k, nw: (b, 0, 0)),
                pl.BlockSpec((D_pad, C_pad), lambda b, k, nw: (0, 0)),      # W_pool
                pl.BlockSpec((1, 1, C_pad), lambda b, k, nw: (k, 0, 0)),    # bias+delta[k]
                pl.BlockSpec((1, C_pad), lambda b, k, nw: (0, 0)),          # bias
            ],
            out_specs=[
                pl.BlockSpec((1, S, D_pad), lambda b, k, nw: (b, k, 0)),    # pooled
                pl.BlockSpec((1, S, C_pad), lambda b, k, nw: (b, k, 0)),    # scores
            ],
            scratch_shapes=[
                pltpu.VMEM((S_SRC, D_pad), f32),   # shifted (rolled) masked sequence
                pltpu.VMEM((S, D_pad), f32),       # running window max (carried over k)
            ],
        ),
        compiler_params=pltpu.CompilerParams(
            dimension_semantics=("parallel", "arbitrary"),
            vmem_limit_bytes=vmem_limit,
        ),
        cost_estimate=pl.CostEstimate(flops=int(flops), transcendentals=0,
                                      bytes_accessed=int(bytes_accessed)),
    )(n_words_arr, x_pad, w_pool, bpd, bias)

    # ner_output directly on the padded scores (padding lanes are -1e30).
    ner_output = jnp.argmax(scores_pad, axis=-1)
    scores = scores_pad[:, :, :C]                 # data['ner_scores']

    # data['span_pooled'] = concat([pooled, len_emb]): the len_emb half is a pure
    # broadcast of the embedding table over the canonical layout (layout plumbing
    # done in the wrapper instead of a non-lane-aligned concat in the kernel).
    row = jnp.arange(N)
    k_of_row = row // S + 1
    start_of_row = row % S
    valid = (start_of_row[None, :] + k_of_row[None, :]) <= n_words_arr[:, None]
    len_emb = jnp.where(valid[:, :, None],
                        emb_table.astype(bf16)[k_of_row - 1][None, :, :],
                        jnp.zeros((), bf16))
    pooled_d = pooled[:, :, :D] if D_pad != D else pooled
    span_pooled = jnp.concatenate([pooled_d, len_emb], axis=-1)

    return span_pooled, scores, ner_output


# ----------------------------------- demo ------------------------------------
if __name__ == "__main__":
    B, S0, D = 2, 8, 32           # batch, seq len, encoder hidden dim
    max_span_len = 4
    span_len_embedding_dim = 25
    entities = ["None", "PER", "ORG", "LOC", "MISC"]
    C = len(entities)
    n_words = [8, 6]              # per-sentence lengths (<= S0)

    key = jax.random.PRNGKey(0)
    k_x, k_emb, k_w, k_b = jax.random.split(key, 4)
    word_encodings = jax.random.normal(k_x, (B, S0, D), dtype=jnp.float32)
    emb_table = jax.random.normal(k_emb, (max_span_len, span_len_embedding_dim),
                                  dtype=jnp.float32)
    input_dim = D + span_len_embedding_dim
    w_linear = jax.random.normal(k_w, (C, input_dim), dtype=jnp.float32) * 0.1
    b_linear = jax.random.normal(k_b, (C,), dtype=jnp.float32) * 0.1

    span_pooled, scores, ner_output = span_ner_forward(
        word_encodings, n_words, emb_table, w_linear, b_linear, max_span_len)
    jax.block_until_ready((span_pooled, scores, ner_output))

    # ------------- correctness check against the module's math ---------------
    S = _round_up(S0, 16)
    N = max_span_len * S
    x_np = np.asarray(word_encodings)
    emb_np = np.asarray(emb_table)
    w_np = np.asarray(w_linear)
    b_np = np.asarray(b_linear)
    sp_np = np.asarray(span_pooled).astype(np.float32)
    sc_np = np.asarray(scores)
    ner_np = np.asarray(ner_output)

    span_rows = canonical_span_ids(n_words, S, max_span_len)
    for b in range(B):
        # the canonical valid rows enumerate exactly the module's span set
        assert {se for _, se in span_rows[b]} == get_all_span_ids(
            n_words[b], max_span_len)
        rows = [r for r, _ in span_rows[b]]
        ref_pooled = np.stack([
            np.concatenate([x_np[b, s:e].max(axis=0), emb_np[e - s - 1]])
            for _, (s, e) in span_rows[b]])
        ref_scores = ref_pooled @ w_np.T + b_np
        # bf16 span_pooled storage / bf16 MXU operands -> bf16-level tolerances
        np.testing.assert_allclose(sp_np[b, rows], ref_pooled,
                                   rtol=2e-2, atol=2e-2)
        np.testing.assert_allclose(sc_np[b, rows], ref_scores,
                                   rtol=5e-2, atol=5e-2)
        # argmax must match wherever the reference margin is clearly > bf16 noise
        top2 = np.sort(ref_scores, axis=-1)[:, -2:]
        confident = (top2[:, 1] - top2[:, 0]) > 0.2
        np.testing.assert_array_equal(
            ner_np[b, np.asarray(rows)][confident],
            ref_scores.argmax(-1)[confident])
        # padding rows: zero span_pooled, bias-only scores (as in the module)
        pad_rows = sorted(set(range(N)) - set(rows))
        np.testing.assert_allclose(sp_np[b, pad_rows], 0.0, atol=1e-6)
        np.testing.assert_allclose(sc_np[b, pad_rows],
                                   np.broadcast_to(b_np, (len(pad_rows), C)),
                                   rtol=1e-5, atol=1e-5)

    # host-side span2pred equivalent (data['pred_entities'])
    none_idx = entities.index("None")
    pred_entities = []
    for b in range(B):
        preds = {}
        for r, (s, e) in span_rows[b]:
            p = int(ner_np[b, r])
            if p != none_idx:
                preds[(s, e)] = entities[p]
        pred_entities.append(preds)

    print("KERNEL_OK")
</pallas_src>

<mosaic_0001>
module attributes {stable_mosaic.version = 11 : i64} {
  func.func @kernel(%arg0: i32, %arg1: i32, %arg2: memref<2xi32, #tpu.memory_space<smem>>, %arg3: memref<1x24x128xf32, #tpu.memory_space<vmem>>, %arg4: memref<128x128xbf16, #tpu.memory_space<vmem>>, %arg5: memref<1x1x128xf32, #tpu.memory_space<vmem>>, %arg6: memref<1x128xf32, #tpu.memory_space<vmem>>, %arg7: memref<1x16x128xbf16, #tpu.memory_space<vmem>>, %arg8: memref<1x16x128xf32, #tpu.memory_space<vmem>>, %arg9: memref<24x128xf32, #tpu.memory_space<vmem>>, %arg10: memref<16x128xf32, #tpu.memory_space<vmem>>) attributes {dimension_semantics = [#tpu.dimension_semantics<parallel>, #tpu.dimension_semantics<arbitrary>], iteration_bounds = array<i64: 2, 4>, scalar_prefetch = 1 : i64, scratch_operands = 2 : i64, tpu.core_type = #tpu.core_type<tc>, window_params = [{transform_indices = @transform_0, window_bounds = array<i64: 1, 24, 128>}, {pipeline_mode = #tpu.pipeline_mode<synchronous>, transform_indices = @transform_1, window_bounds = array<i64: 128, 128>}, {transform_indices = @transform_2, window_bounds = array<i64: 1, 1, 128>}, {pipeline_mode = #tpu.pipeline_mode<synchronous>, transform_indices = @transform_3, window_bounds = array<i64: 1, 128>}, {transform_indices = @transform_4, window_bounds = array<i64: 1, 16, 128>}, {transform_indices = @transform_5, window_bounds = array<i64: 1, 16, 128>}]} {
    %0 = arith.index_cast %arg0 : i32 to index
    %1 = memref.load %arg2[%0] : memref<2xi32, #tpu.memory_space<smem>>
    %2 = tpu.iota {dimensions = array<i32: 0>} : vector<16x1xi32>
    %c0_i32 = arith.constant 0 : i32
    %3 = arith.cmpi eq, %arg1, %c0_i32 : i32
    %4 = arith.extui %3 : i1 to i32
    %c0_i32_0 = arith.constant 0 : i32
    %5 = arith.cmpi ne, %4, %c0_i32_0 : i32
    scf.if %5 {
      %c0_18 = arith.constant 0 : index
      %c0_19 = arith.constant 0 : index
      %c0_20 = arith.constant 0 : index
      %39 = vector.load %arg3[%c0_18, %c0_19, %c0_20] : memref<1x24x128xf32, #tpu.memory_space<vmem>>, vector<1x24x128xf32>
      %40 = vector.shape_cast %39 : vector<1x24x128xf32> to vector<24x128xf32>
      %41 = tpu.iota {dimensions = array<i32: 0>} : vector<24x1xi32>
      %42 = vector.broadcast %1 : i32 to vector<24x1xi32>
      %43 = arith.cmpi slt, %41, %42 : vector<24x1xi32>
      %cst_21 = arith.constant -3.40282347E+38 : f32
      %44 = vector.shape_cast %43 : vector<24x1xi1> to vector<24x1xi1>
      %45 = vector.broadcast %44 : vector<24x1xi1> to vector<24x128xi1>
      %46 = vector.broadcast %cst_21 : f32 to vector<24x128xf32>
      %47 = arith.select %45, %40, %46 : vector<24x128xi1>, vector<24x128xf32>
      %c0_22 = arith.constant 0 : index
      %c0_23 = arith.constant 0 : index
      %48 = vector.load %arg9[%c0_22, %c0_23] : memref<24x128xf32, #tpu.memory_space<vmem>>, vector<24x128xf32>
      tpu.vector_store %arg9[%c0_22, %c0_23], %47 {strides = array<i32>} : memref<24x128xf32, #tpu.memory_space<vmem>>, vector<24x128xf32>,
      %49 = vector.extract_strided_slice %47 {offsets = [0, 0], sizes = [16, 128], strides = [1, 1]} : vector<24x128xf32> to vector<16x128xf32>
      %c0_24 = arith.constant 0 : index
      %c0_25 = arith.constant 0 : index
      %50 = vector.load %arg10[%c0_24, %c0_25] : memref<16x128xf32, #tpu.memory_space<vmem>>, vector<16x128xf32>
      tpu.vector_store %arg10[%c0_24, %c0_25], %49 {strides = array<i32>} : memref<16x128xf32, #tpu.memory_space<vmem>>, vector<16x128xf32>,
    } else {
    }
    %c0_i32_1 = arith.constant 0 : i32
    %6 = arith.cmpi sgt, %arg1, %c0_i32_1 : i32
    %7 = arith.extui %6 : i1 to i32
    %c0_i32_2 = arith.constant 0 : i32
    %8 = arith.cmpi ne, %7, %c0_i32_2 : i32
    scf.if %8 {
      %c0_18 = arith.constant 0 : index
      %c0_19 = arith.constant 0 : index
      %39 = vector.load %arg9[%c0_18, %c0_19] : memref<24x128xf32, #tpu.memory_space<vmem>>, vector<24x128xf32>
      %c23_i32 = arith.constant 23 : i32
      %40 = tpu.dynamic_rotate %39 by %c23_i32 dim 0 : vector<24x128xf32>, i32 -> vector<24x128xf32>
      %c0_20 = arith.constant 0 : index
      %c0_21 = arith.constant 0 : index
      %41 = vector.load %arg9[%c0_20, %c0_21] : memref<24x128xf32, #tpu.memory_space<vmem>>, vector<24x128xf32>
      tpu.vector_store %arg9[%c0_20, %c0_21], %40 {strides = array<i32>} : memref<24x128xf32, #tpu.memory_space<vmem>>, vector<24x128xf32>,
      %c0_22 = arith.constant 0 : index
      %c0_23 = arith.constant 0 : index
      %42 = vector.load %arg10[%c0_22, %c0_23] : memref<16x128xf32, #tpu.memory_space<vmem>>, vector<16x128xf32>
      %43 = vector.extract_strided_slice %40 {offsets = [0, 0], sizes = [16, 128], strides = [1, 1]} : vector<24x128xf32> to vector<16x128xf32>
      %44 = arith.maximumf %42, %43 : vector<16x128xf32>
      %c0_24 = arith.constant 0 : index
      %c0_25 = arith.constant 0 : index
      %45 = vector.load %arg10[%c0_24, %c0_25] : memref<16x128xf32, #tpu.memory_space<vmem>>, vector<16x128xf32>
      tpu.vector_store %arg10[%c0_24, %c0_25], %44 {strides = array<i32>} : memref<16x128xf32, #tpu.memory_space<vmem>>, vector<16x128xf32>,
    } else {
    }
    %c1_i32 = arith.constant 1 : i32
    %9 = arith.addi %arg1, %c1_i32 : i32
    %10 = vector.broadcast %9 : i32 to vector<16x1xi32>
    %11 = arith.addi %2, %10 : vector<16x1xi32>
    %12 = vector.broadcast %1 : i32 to vector<16x1xi32>
    %13 = arith.cmpi sle, %11, %12 : vector<16x1xi32>
    %c0 = arith.constant 0 : index
    %c0_3 = arith.constant 0 : index
    %14 = vector.load %arg10[%c0, %c0_3] : memref<16x128xf32, #tpu.memory_space<vmem>>, vector<16x128xf32>
    %cst = arith.constant 0.000000e+00 : f32
    %15 = vector.shape_cast %13 : vector<16x1xi1> to vector<16x1xi1>
    %16 = vector.broadcast %15 : vector<16x1xi1> to vector<16x128xi1>
    %17 = vector.broadcast %cst : f32 to vector<16x128xf32>
    %18 = arith.select %16, %14, %17 : vector<16x128xi1>, vector<16x128xf32>
    %19 = arith.truncf %18 : vector<16x128xf32> to vector<16x128xbf16>
    %c0_4 = arith.constant 0 : index
    %c0_5 = arith.constant 0 : index
    %c0_6 = arith.constant 0 : index
    %20 = vector.load %arg7[%c0_4, %c0_5, %c0_6] : memref<1x16x128xbf16, #tpu.memory_space<vmem>>, vector<1x16x128xbf16>
    %21 = vector.shape_cast %20 : vector<1x16x128xbf16> to vector<16x128xbf16>
    %22 = vector.shape_cast %19 : vector<16x128xbf16> to vector<1x16x128xbf16>
    tpu.vector_store %arg7[%c0_4, %c0_5, %c0_6], %22 {strides = array<i32>} : memref<1x16x128xbf16, #tpu.memory_space<vmem>>, vector<1x16x128xbf16>,
    %c0_7 = arith.constant 0 : index
    %c0_8 = arith.constant 0 : index
    %23 = vector.load %arg4[%c0_7, %c0_8] : memref<128x128xbf16, #tpu.memory_space<vmem>>, vector<128x128xbf16>
    %cst_9 = arith.constant dense<0.000000e+00> : vector<16x128xf32>
    %24 = tpu.matmul %19, %23, %cst_9 {dimension_numbers = #tpu.dot_dimension_numbers<[1], [0], [0], [1], [0, 0, 1, 1], [], []>} : vector<16x128xbf16>, vector<128x128xbf16>, vector<16x128xf32> -> vector<16x128xf32>
    %c0_10 = arith.constant 0 : index
    %c0_11 = arith.constant 0 : index
    %c0_12 = arith.constant 0 : index
    %25 = vector.load %arg5[%c0_10, %c0_11, %c0_12] : memref<1x1x128xf32, #tpu.memory_space<vmem>>, vector<1x1x128xf32>
    %26 = vector.shape_cast %25 : vector<1x1x128xf32> to vector<1x128xf32>
    %c0_13 = arith.constant 0 : index
    %c0_14 = arith.constant 0 : index
    %27 = vector.load %arg6[%c0_13, %c0_14] : memref<1x128xf32, #tpu.memory_space<vmem>>, vector<1x128xf32>
    %28 = vector.shape_cast %13 : vector<16x1xi1> to vector<16x1xi1>
    %29 = vector.broadcast %28 : vector<16x1xi1> to vector<16x128xi1>
    %30 = vector.shape_cast %26 : vector<1x128xf32> to vector<1x128xf32>
    %31 = vector.broadcast %30 : vector<1x128xf32> to vector<16x128xf32>
    %32 = vector.shape_cast %27 : vector<1x128xf32> to vector<1x128xf32>
    %33 = vector.broadcast %32 : vector<1x128xf32> to vector<16x128xf32>
    %34 = arith.select %29, %31, %33 : vector<16x128xi1>, vector<16x128xf32>
    %35 = arith.addf %24, %34 : vector<16x128xf32>
    %c0_15 = arith.constant 0 : index
    %c0_16 = arith.constant 0 : index
    %c0_17 = arith.constant 0 : index
    %36 = vector.load %arg8[%c0_15, %c0_16, %c0_17] : memref<1x16x128xf32, #tpu.memory_space<vmem>>, vector<1x16x128xf32>
    %37 = vector.shape_cast %36 : vector<1x16x128xf32> to vector<16x128xf32>
    %38 = vector.shape_cast %35 : vector<16x128xf32> to vector<1x16x128xf32>
    tpu.vector_store %arg8[%c0_15, %c0_16, %c0_17], %38 {strides = array<i32>} : memref<1x16x128xf32, #tpu.memory_space<vmem>>, vector<1x16x128xf32>,
    return
  }
  func.func @transform_0(%arg0: i32, %arg1: i32, %arg2: memref<2xi32, #tpu.memory_space<smem>>) -> (i32, i32, i32) {
    %c0_i32 = arith.constant 0 : i32
    %c0_i32_0 = arith.constant 0 : i32
    %c0_i32_1 = arith.constant 0 : i32
    return %arg0, %c0_i32, %c0_i32_0 : i32, i32, i32
  }
  func.func @transform_1(%arg0: i32, %arg1: i32, %arg2: memref<2xi32, #tpu.memory_space<smem>>) -> (i32, i32) {
    %c0_i32 = arith.constant 0 : i32
    %c0_i32_0 = arith.constant 0 : i32
    %c0_i32_1 = arith.constant 0 : i32
    return %c0_i32, %c0_i32_0 : i32, i32
  }
  func.func @transform_2(%arg0: i32, %arg1: i32, %arg2: memref<2xi32, #tpu.memory_space<smem>>) -> (i32, i32, i32) {
    %c0_i32 = arith.constant 0 : i32
    %c0_i32_0 = arith.constant 0 : i32
    %c0_i32_1 = arith.constant 0 : i32
    return %arg1, %c0_i32, %c0_i32_0 : i32, i32, i32
  }
  func.func @transform_3(%arg0: i32, %arg1: i32, %arg2: memref<2xi32, #tpu.memory_space<smem>>) -> (i32, i32) {
    %c0_i32 = arith.constant 0 : i32
    %c0_i32_0 = arith.constant 0 : i32
    %c0_i32_1 = arith.constant 0 : i32
    return %c0_i32, %c0_i32_0 : i32, i32
  }
  func.func @transform_4(%arg0: i32, %arg1: i32, %arg2: memref<2xi32, #tpu.memory_space<smem>>) -> (i32, i32, i32) {
    %c0_i32 = arith.constant 0 : i32
    %c0_i32_0 = arith.constant 0 : i32
    return %arg0, %arg1, %c0_i32 : i32, i32, i32
  }
  func.func @transform_5(%arg0: i32, %arg1: i32, %arg2: memref<2xi32, #tpu.memory_space<smem>>) -> (i32, i32, i32) {
    %c0_i32 = arith.constant 0 : i32
    %c0_i32_0 = arith.constant 0 : i32
    return %arg0, %arg1, %c0_i32 : i32, i32, i32
  }
}

</mosaic_0001>

<bundles_post_ra>
// kernel: tpu_custom_call.1
= control target key start
LH: loop header
LB: loop body
LE: loop exit
PB: predicated region body
PF: predicated region fallthrough
CT: control target
= control target key end

     0   :  { %s1553_s0 = inlined_call_operand.hbm [shape: s32[2], index: 0, kind: input, shape index: {}]   ;;  %s1554_s1 = inlined_call_operand.hbm [shape: f32[2,24,128], index: 1, kind: input, shape index: {}]   ;;  %s1555_s2 = inlined_call_operand.hbm [shape: bf16[128,128], index: 2, kind: input, shape index: {}]   ;;  %s1556_s3 = inlined_call_operand.vmem [shape: f32[4,1,128], index: 3, kind: input, shape index: {}]   ;;  %s1557_s4 = inlined_call_operand.vmem [shape: f32[1,128], index: 4, kind: input, shape index: {}]   ;;  %s1558_s5 = inlined_call_operand.hbm [shape: bf16[2,64,128], index: 5, kind: output, shape index: {0}]   ;;  %s1559_s6 = inlined_call_operand.hbm [shape: f32[2,64,128], index: 6, kind: output, shape index: {1}]  }
   0x1   :  { %1571 = sst [smem:[#allocation24_spill]] %s1555_s2  ;;  %s901_s23 = scalar_lea.hbm %s1553_s0, 16 }
   0x2   :  { %1572 = sst [smem:[#allocation25_spill]] %s1557_s4  ;;  %p902_p0 = scmp.ne.s32.totalorder %s1553_s0, %s901_s23 }
   0x3   :  { %1573 = sst [smem:[#allocation26_spill]] %s1559_s6  ;;  %p905_p1 = scmp.lt.u32.totalorder %s901_s23, %s1553_s0 }
   0x5   :  { %p907_p2 = pnand %p905_p1, %p902_p0 }
   0x7   :  { %910 = shalt.err (!%p907_p2)  }
   0x8   :  { %s1131_s28 = smov [#allocation5]  }
   0x9   :  { %13 = dma.hbm_to_smem %s1553_s0, 16, %s1131_s28, [#allocation4] }
   0xa   :  { %1069 = dma.done.wait [#allocation4], 16 }
   0xb   :  { %1070 = vsyncadd [#allocation4], 4294967280 }
   0xc   :  { %15 = sfence }
   0xd   :  { %16 = vsyncpa [#allocation7], 0 }
   0xe   :  { %18 = vsyncpa [#allocation7 + $0x1], 0 }
   0xf   :  { %19 = vsyncpa [#allocation10], 0 }
  0x10   :  { %20 = vsyncpa [#allocation8], 0 }
  0x11   :  { %22 = vsyncpa [#allocation8 + $0x1], 0 }
  0x12   :  { %23 = vsyncpa [#allocation13], 0 }
  0x13   :  { %25 = vsyncpa [#allocation13 + $0x1], 0  ;;  %s1193_s7 = smov 0   ;;  %s1195_s8 = smov 0  }
  0x14   :  { %s1197_s9 = smov 0   ;;  %s1199_s10 = smov 0  }
  0x15   :  { %s1201_s11 = smov 0   ;;  %s1203_s0 = smov 0  }
  0x16   :  { %s1205_s12 = smov 0   ;;  %s1207_s13 = smov 0  }
  0x17   :  { %s1209_s14 = smov 0   ;;  %s1211_s15 = smov 0  }
  0x18   :  { %s1213_s16 = smov 0  }
  0x19 LB: > { %1574 = sst [smem:[#allocation19_spill]] %s1089_s7  ;;  %s688_s17 = sadd.s32 4294967295, %s1129_s16   ;;  %s1129_s16 = sphi %s1213_s16, %s31_s16   ;;  %s1125_s15 = sphi %s1211_s15, %s1613_s15   ;;  %s1121_s14 = sphi %s1209_s14, %s1612_s14   ;;  %s1117_s13 = sphi %s1207_s13, %s1611_s13   ;;  %s1113_s12 = sphi %s1205_s12, %s1602_s12   ;;  %s1109_s0 = sphi %s1203_s0, %s1610_s0   ;;  %s1105_s11 = sphi %s1201_s11, %s1609_s11   ;;  %s1101_s10 = sphi %s1199_s10, %s1608_s10   ;;  %s1097_s9 = sphi %s1197_s9, %s1607_s9   ;;  %s1093_s8 = sphi %s1195_s8, %s1606_s8   ;;  %s1089_s7 = sphi %s1193_s7, %s1605_s7  }
  0x1a   : > { %1575 = sst [smem:[#allocation20_spill]] %s1121_s14  ;;  %s689_s18 = sadd.s32 4294967294, %s1129_s16  }
  0x1b   : > { %p63_p3 = scmp.ne.s32.totalorder %s1105_s11, %s1101_s10  ;;  %p1249_p4 = scmp.eq.s32.totalorder %s688_s17, 0 }
  0x1c   : > { %p156_p5 = scmp.ne.s32.totalorder %s1097_s9, %s1093_s8  ;;  %p157_p7 = scmp.eq.s32.totalorder %s688_s17, 7 }
  0x1d   : > { %s1576_s19 = scalar_select %p1249_p4, 1, 0 }
  0x1e   : > { %p1258_p6 = por %p1249_p4, %p63_p3  ;;  %p162_p8 = scmp.ne.s32.totalorder %s1093_s8, %s1089_s7 }
  0x1f   : > { %p163_p9 = scmp.eq.s32.totalorder %s689_s18, 7  ;;  %p1264_p10 = por %p157_p7, %p156_p5 }
  0x20   : > { %s1577_s21 = scalar_select %p1258_p6, 1, 0 }
  0x21   : > { %s1578_s22 = scalar_select %p1264_p10, 1, 0 }
  0x22   : > { %p690_p11 = scmp.ge.s32.totalorder %s1129_s16, 1  ;;  %p1269_p12 = por %p163_p9, %p162_p8 }
  0x23   : > { %p198_p13 = scmp.lt.s32.totalorder %s1129_s16, 9  ;;  %s1132_s25 = smov [#allocation9]  }
  0x24   : > { %s1579_s23 = scalar_select %p1269_p12, 1, 0 }
  0x25   : > { %p1274_p0 = pnand %p690_p11, %p198_p13  ;;  %s210_s26 = sshll.u32 %s1132_s25, 4  ;;  %s211_s26 = int_to_ptr.vmem [resolvable:$true] %s210_s26 }
  0x26   : > { %1580 = sst [smem:[#allocation21_spill]] %s1579_s23  ;;  %s1583_s2 = sld [smem:[#allocation24_spill]] }
  0x27   : > { %s1581_s24 = scalar_select %p1274_p0, 1, 0 }
  0x28   : > { %p774_p1 = pneg %p1274_p0 }
  0x2a   : > { %p1282_p2 = pnand %p774_p1, %p1249_p4 }
  0x2c   : > { %s911_s30 = scalar_lea.hbm %s1583_s2, 1024  ;;  %p913_p5 = pneg %p1282_p2 }
  0x2d   : > { %p912_p3 = scmp.ne.s32.totalorder %s1583_s2, %s911_s30  ;;  %p918_p9 = scmp.lt.u32.totalorder %s911_s30, %s1583_s2 }
  0x2f   : > { %p914_p7 = pnand %p913_p5, %p912_p3 }
  0x31   : > { %p915_p8 = pneg %p914_p7 }
  0x33   : > { %p920_p11 = pnand %p918_p9, %p915_p8 }
  0x35   : > { %923 = shalt.err (!%p920_p11)
}
  0x36   : > { %s924_s20 = scalar_lea.vmem %s211_s26, 1024  ;;  %p932_p10 = scmp.lt.s32.totalorder %s211_s26, %s211_s26 }
  0x37   : > { %p925_p13 = scmp.ne.s32.totalorder %s211_s26, %s924_s20  ;;  %p933_p4 = scmp.lt.s32.totalorder %s924_s20, %s924_s20 }
  0x39   : > { %p927_p1 = pnand %p925_p13, %p913_p5  ;;  %p934_p6 = por %p933_p4, %p932_p10 }
  0x3b   : > { %p928_p12 = pneg %p927_p1 }
  0x3d   : > { %p935_p0 = pnand %p934_p6, %p928_p12 }
  0x3f   : > { %938 = shalt.err (!%p935_p0)
}
  0x40   : > { %s1133_s28 = smov 64   ;;  %s1134_s29 = smov 4  }
  0x41   : > { %777 = dma.hbm_to_vmem [thread:$0]  (!%p1282_p2), %s1583_s2, 1024, %s211_s26, [#allocation10], %s1133_s28, %s1133_s28, %s1134_s29  }
  0x42   : > { %s40_s20 = sadd.s32 1, %s1121_s14  ;;  %s43_s17 = sadd.s32 1, %s1125_s15 }
  0x43   : > { %p41_p4 = scmp.ge.s32.totalorder %s40_s20, 4  ;;  %s50_s18 = sadd.s32 1, %s1109_s0 }
  0x44   : > { %p57_p6 = scmp.ne.s32.totalorder %s1109_s0, %s1105_s11  ;;  %p58_p10 = scmp.eq.s32.totalorder %s1129_s16, 0 }
  0x45   : > { %s1615_s20 = smov (%p41_p4, %s40_s20), 0  ;;  %s1617_s17 = smov (!%p41_p4, %s43_s17), %s1125_s15 }
  0x46   : > { %1584 = sst [smem:[#allocation22_spill]] %s1615_s20  ;;  %s142_s27 = ssub.s32 %s1121_s14, %s1615_s20 }
  0x47   : > { %p45_p12 = scmp.ge.s32.totalorder %s1617_s17, 2  ;;  %p790_p0 = scmp.lt.s32.totalorder %s1129_s16, 8 }
  0x48   : > { %p1314_p2 = por %p58_p10, %p57_p6  ;;  %s227_s25 = sand.u32 1, %s1109_s0  }
  0x49   : > { %s1619_s17 = smov (%p45_p12, %s1617_s17), 0  ;;  %s761_s28 = smul.u32 24, %s227_s25 }
  0x4a   : > { %1586 = sst [smem:[#allocation23_spill]] %s1619_s17  ;;  %s47_s29 = ssub.s32 %s1125_s15, %s1619_s17 }
  0x4b   : > { %s762_s30 = smul.u32 384, %s1125_s15  ;;  %p48_p3 = scmp.eq.s32.totalorder %s47_s29, 0 }
  0x4c   : > { %s143_s10 = sor.u32 %s142_s27, %s47_s29  ;;  %s1587_s20 = sadd.s32 1, %s1097_s9 }
  0x4d   : > { %p144_p5 = scmp.eq.s32.totalorder %s143_s10, 0  ;;  %s1335_s6 = scalar_lea.hbm %s1554_s1, %s762_s30 }
  0x4e   : > { %s1325_s2 = scalar_select %p48_p3, %s1109_s0, %s50_s18  }
  0x4f   : > { %s1330_s14 = scalar_select %p144_p5, %s1097_s9, %s1587_s20  }
  0x50   : > { %s231_s4 = scalar_lea.vmem [#allocation6], %s761_s28  ;;  %p1343_p7 = pnand %p790_p0, %p1314_p2 }
  0x51   : > { %s238_s17 = sshll.u32 %s231_s4, 4  ;;  %s1347_s20 = scalar_lea.sflag [#allocation7], %s227_s25  ;;  %s1337_s17 = int_to_ptr.vmem [resolvable:$true] %s238_s17 }
  0x52   : > { %s939_s7 = scalar_lea.hbm %s1335_s6, 384  ;;  %p941_p9 = pneg %p1343_p7 }
  0x53   : > { %p940_p8 = scmp.ne.s32.totalorder %s1335_s6, %s939_s7  ;;  %s944_s27 = scalar_lea.hbm %s1554_s1, 768 }
  0x54   : > { %p945_p1 = scmp.lt.u32.totalorder %s1335_s6, %s1554_s1  ;;  %p946_p4 = scmp.lt.u32.totalorder %s944_s27, %s939_s7 }
  0x55   : > { %p942_p11 = pnand %p941_p9, %p940_p8  ;;  %p948_p10 = scmp.lt.u32.totalorder %s939_s7, %s1335_s6 }
  0x56   : > { %p947_p6 = por %p946_p4, %p945_p1 }
  0x57   : > { %p943_p13 = pneg %p942_p11 }
  0x58   : > { %p949_p12 = por %p948_p10, %p947_p6 }
  0x5a   : > { %p950_p0 = pnand %p949_p12, %p943_p13 }
  0x5c   : > { %953 = shalt.err (!%p950_p0)
}
  0x5d   : > { %s954_s25 = scalar_lea.vmem %s1337_s17, 384  ;;  %s1135_s29 = smov [#allocation6]  }
  0x5e   : > { %p955_p2 = scmp.ne.s32.totalorder %s1337_s17, %s954_s25  ;;  %s959_s30 = sshll.u32 %s1135_s29, 4  ;;  %s960_s30 = int_to_ptr.vmem [resolvable:$false] %s959_s30 }
  0x5f   : > { %s961_s10 = scalar_lea.vmem %s960_s30, 768  ;;  %p962_p8 = scmp.lt.s32.totalorder %s1337_s17, %s960_s30 }
  0x60   : > { %p957_p3 = pnand %p955_p2, %p941_p9  ;;  %p963_p11 = scmp.lt.s32.totalorder %s961_s10, %s954_s25 }
  0x62   : > { %p958_p5 = pneg %p957_p3  ;;  %p964_p1 = por %p963_p11, %p962_p8 }
  0x64   : > { %p965_p4 = pnand %p964_p1, %p958_p5 }
  0x66   : > { %968 = shalt.err (!%p965_p4)
}
  0x67   : > { %s1136_s7 = smov 128   ;;  %s1137_s4 = smov 8  }
  0x68   : > { %781 = dma.hbm_to_vmem [thread:$0]  (!%p1343_p7), %s1335_s6, 384, %s1337_s17, %s1347_s20, %s1136_s7, %s1136_s7, %s1137_s4  }
  0x69   : > { %p1589_p9 = scmp.ne.s32.totalorder %s1581_s24, 0 }
  0x6a   : > { %s258_s23 = sand.u32 (!%p1589_p9), 1, %s1105_s11   ;;  %p1590_p13 = scmp.ne.s32.totalorder (!%p1589_p9), %s1577_s21, 0 }
  0x6b   : > { %256 = sbr.rel (%p1589_p9) target bundleno = 408 (0x198), region = 36  ;;  %s259_s26 = scalar_lea.sflag (!%p1589_p9), [#allocation7], %s258_s23 }
  0x6c   : > { %s763_s27 = smul.u32 (!%p1589_p9), 24, %s258_s23 }
  0x6e   : > { %s262_s28 = scalar_lea.vmem (!%p1589_p9), [#allocation6], %s763_s27 }
  0x72   : > { %1072 = dma.done.wait (%p1590_p13), %s259_s26, 384  }
  0x73   : > { %1074 = vsyncadd (%p1590_p13), %s259_s26, 4294966912  ;;  %p1591_p6 = scmp.ne.s32.totalorder %s1576_s19, 0 }
  0x75   : > { %1076 = dma.done.wait (%p1591_p6), [#allocation10], 1024  }
  0x76   : > { %1078 = vsyncadd (%p1591_p6), [#allocation10], 4294966272  ;;  %s1387_s6 = sand.u32 1, %s1093_s8   ;;  %p301_p7 = scmp.lt.s32.totalorder %s1113_s12, 3  ;;  %v308_v0 = vlaneseq }
  0x77   : > { %s1391_s24 = sld [smem:[#allocation5 + %s1117_s13]]  ;;  %s696_s21 = sshll.u32 %s1387_s6, 3 }
  0x78   : > { %s697_s17 = sshll.u32 %s1387_s6, 4  ;;  %v309_v1 = vshrl.u32 %v308_v0, 7  ;;  %s1404_s29 = scalar_lea.vmem [#allocation11], %s696_s21 }
  0x79   : > { %s1396_s18 = scalar_select %p301_p7, %s1113_s12, 3 }
  0x7a   : > { %v1398_v2 = vadd.s32 8, %v309_v1  ;;  %s1406_s30 = scalar_lea.vmem [#allocation12], %s697_s17  ;;  %p698_p10 = scmp.ne.s32.totalorder %s1113_s12, 0 }
  0x7b   : > { %s303_s25 = scalar_lea.vmem %s1556_s3, %s1396_s18  ;;  %v315_v3 = vld [vmem:[%s262_s28] sm:$0xff] (!%p698_p10)  ;;  %v316_v5 = vld [vmem:[%s262_s28 + $0x8] sm:$0xff] (!%p698_p10)  ;;  %v317_v6 = vld [vmem:[%s262_s28 + $0x10] sm:$0xff] (!%p698_p10)  ;;  %v318_v7 = vadd.s32 (!%p698_p10), 16, %v309_v1 }
  0x7c   : > { %314 = sbr.rel (%p698_p10) target bundleno = 131 (0x83), region = 48 }
  0x7d   : > { %v319_v4 = vstv (!%p698_p10), %s1391_s24 }
  0x7e   : > { %vm320_vm0 = vcmp.lt.s32.totalorder (!%p698_p10), %v309_v1, %v319_v4  ;;  %vm321_vm1 = vcmp.lt.s32.totalorder (!%p698_p10), %v1398_v2, %v319_v4  ;;  %vm322_vm2 = vcmp.lt.s32.totalorder (!%p698_p10), %v318_v7, %v319_v4 }
  0x7f   : > { %v329_v8 = vsel (!%p698_p10), %vm320_vm0, %v315_v3, -3.4028235e+38  ;;  %v330_v9 = vsel (!%p698_p10), %vm321_vm1, %v316_v5, -3.4028235e+38  ;;  %v331_v10 = vsel (!%p698_p10), %vm322_vm2, %v317_v6, -3.4028235e+38 }
  0x80   : > { %332 = vst [vmem:[#allocation2] sm:$0xff] (!%p698_p10), %v329_v8  ;;  %335 = vst [vmem:[#allocation3] sm:$0xff] (!%p698_p10), %v329_v8 }
  0x81   : > { %333 = vst [vmem:[#allocation2 + $0x8] sm:$0xff] (!%p698_p10), %v330_v9  ;;  %336 = vst [vmem:[#allocation3 + $0x8] sm:$0xff] (!%p698_p10), %v330_v9 }
  0x82   : > { %334 = vst [vmem:[#allocation2 + $0x10] sm:$0xff] (!%p698_p10), %v331_v10 }
  0x83 PF: > { %p699_p12 = scmp.le.s32.totalorder %s1113_s12, 0 }
  0x84   : > { %vm347_vm3 = vcmp.lt.s32.totalorder (!%p699_p12), %v309_v1, 7 }
  0x85   : > { %340 = sbr.rel (%p699_p12) target bundleno = 144 (0x90), region = 52 }
  0x87   : > { %v341_v11 = vld [vmem:[#allocation2] sm:$0xff] (!%p699_p12)  ;;  %v354_v17 = vld [vmem:[#allocation3] sm:$0xff] (!%p699_p12) }
  0x88   : > { %v342_v12 = vld [vmem:[#allocation2 + $0x8] sm:$0xff] (!%p699_p12)  ;;  %v344_v14 = vrot.slane (!%p699_p12), %v341_v11, 1  ;;  %v355_v18 = vld [vmem:[#allocation3 + $0x8] sm:$0xff] (!%p699_p12) }
  0x89   : > { %v343_v13 = vld [vmem:[#allocation2 + $0x10] sm:$0xff] (!%p699_p12)  ;;  %v345_v15 = vrot.slane (!%p699_p12), %v342_v12, 1 }
  0x8a   : > { %v346_v16 = vrot.slane (!%p699_p12), %v343_v13, 1 }
  0x8b   : > { %v349_v19 = vsel (!%p699_p12), %vm347_vm3, %v344_v14, %v345_v15 }
  0x8c   : > { %v348_v20 = vsel %vm347_vm3, %v345_v15, %v346_v16  ;;  %v350_v21 = vsel %vm347_vm3, %v346_v16, %v344_v14  ;;  %351 = vst [vmem:[#allocation2] sm:$0xff] %v349_v19  ;;  %v356_v22 = vmax.f32 %v354_v17, %v349_v19 }
  0x8d   : > { %352 = vst [vmem:[#allocation2 + $0x8] sm:$0xff] %v348_v20  ;;  %353 = vst [vmem:[#allocation2 + $0x10] sm:$0xff] %v350_v21  ;;  %v357_v23 = vmax.f32 %v355_v18, %v348_v20 }
  0x8e   : > { %358 = vst [vmem:[#allocation3] sm:$0xff] %v356_v22 }
  0x8f   : > { %359 = vst [vmem:[#allocation3 + $0x8] sm:$0xff] %v357_v23 }
  0x90 PF: > { %v893_v24 = vld [vmem:[#allocation9] sm:$0xff]   ;;  %v1138_v25 = vmov 0.0   ;;  %v894_v26 = vld [vmem:[#allocation9 + $0x8] sm:$0xff]   ;;  %vm1139_vm4 = vmmov 0   ;;  %s360_s10 = sadd.s32 1, %s1113_s12  ;;  %v364_v29 = vstv %s1391_s24  ;;  %v895_v30 = vld [vmem:[#allocation9 + $0x10] sm:$0xff]  }
  0x91   : > { %741 = vmatprep.subr.bf16.mxu0 %v1138_v25  ;;  %757 = vmatprep.mubr.msk.bf16.mxu0 %vm1139_vm4, %v1138_v25  ;;  %v361_v27 = vstv %s360_s10  ;;  %v896_v34 = vld [vmem:[#allocation9 + $0x18] sm:$0xff]   ;;  %v897_v35 = vld [vmem:[#allocation9 + $0x20] sm:$0xff]   ;;  %v898_v36 = vld [vmem:[#allocation9 + $0x28] sm:$0xff]   ;;  %s717_s7 = sshll.u32 %s1113_s12, 1  ;;  %s718_s4 = sshll.u32 %s1117_s13, 3 }
  0x92   : > { %742 = vmatpush3.bf16.msra.mxu0 %v893_v24  ;;  %v362_v28 = vadd.s32 %v361_v27, %v309_v1  ;;  %v899_v37 = vld [vmem:[#allocation9 + $0x30] sm:$0xff]   ;;  %v363_v38 = vadd.s32 %v361_v27, %v1398_v2  ;;  %v900_v39 = vld [vmem:[#allocation9 + $0x38] sm:$0xff]   ;;  %s1433_s23 = sadd.s32 %s718_s4, %s717_s7  ;;  %s529_s26 = sshll.u32 %s1404_s29, 4  ;;  %s1443_s26 = int_to_ptr.vmem [resolvable:$true] %s529_s26 }
  0x93   : > { %743 = vmatprep.subr.bf16.mxu0 %v1138_v25  ;;  %s719_s27 = sshll.u32 %s1433_s23, 6  ;;  %s509_s17 = scalar_lea.sflag [#allocation8], %s1387_s6 }
  0x94   : > { %vm1414_vm5 = vcmp.le.s32.totalorder %v362_v28, %v364_v29  ;;  %vm1421_vm6 = vcmp.le.s32.totalorder %v363_v38, %v364_v29  ;;  %s1441_s21 = scalar_lea.hbm %s1558_s5, %s719_s27  ;;  %s969_s12 = scalar_lea.vmem %s1443_s26, 128 }
  0x95   : > { %v367_v32 = vld [vmem:[#allocation3] sm:$0xff]  ;;  %vm712_vm7 = vmpackc.low %vm1421_vm6, %vm1414_vm5  ;;  %p970_p0 = scmp.ne.s32.totalorder %s1443_s26, %s969_s12  ;;  %p1596_p2 = scmp.ne.s32.totalorder %s1578_s22, 0 }
  0x96   : > { %744 = vmatpush3.bf16.msra.mxu0 %v894_v26  ;;  %v373_v33 = vsel %vm1414_vm5, %v367_v32, 0.0  ;;  %v368_v40 = vld [vmem:[#allocation3 + $0x8] sm:$0xff]  ;;  %s1140_s13 = smov [#allocation11]  }
  0x97   : > { %745 = vmatprep.subr.bf16.mxu0 %v1138_v25  ;;  %v713_v42 = vpack.c.bf16 %v368_v40, %v367_v32  ;;  %v374_v43 = vsel %vm1421_vm6, %v368_v40, 0.0  ;;  %p971_p3 = pnand %p970_p0, %p1596_p2  ;;  %s973_s19 = sshll.u32 %s1140_s13, 4  ;;  %s974_s19 = int_to_ptr.vmem [resolvable:$false] %s973_s19 }
  0x98   : > { %v730_v44 = vpack.c.bf16 %v374_v43, %v373_v33  ;;  %s975_s20 = scalar_lea.vmem %s974_s19, 256  ;;  %p976_p8 = scmp.lt.s32.totalorder %s1443_s26, %s974_s19 }
  0x99   : > { %p972_p5 = pneg %p971_p3  ;;  %p977_p11 = scmp.lt.s32.totalorder %s975_s20, %s969_s12 }
  0x9a   : > { %746 = vmatpush3.bf16.msra.mxu0 %v895_v30  ;;  %731 = vst [vmem:[%s1404_s29] sm:$0xff] %v730_v44  }
  0x9b   : > { %747 = vmatprep.subr.bf16.mxu0 %v1138_v25  ;;  %p978_p1 = por %p977_p11, %p976_p8 }
  0x9d   : > { %p979_p4 = pnand %p978_p1, %p972_p5 }
  0x9e   : > { %748 = vmatpush3.bf16.msra.mxu0 %v896_v34 }
  0x9f   : > { %749 = vmatprep.subr.bf16.mxu0 %v1138_v25 }
  0xa2   : > { %750 = vmatpush3.bf16.msra.mxu0 %v897_v35 }
  0xa3   : > { %751 = vmatprep.subr.bf16.mxu0 %v1138_v25 }
  0xa6   : > { %752 = vmatpush3.bf16.msra.mxu0 %v898_v36 }
  0xa7   : > { %753 = vmatprep.subr.bf16.mxu0 %v1138_v25 }
  0xaa   : > { %754 = vmatpush3.bf16.msra.mxu0 %v899_v37 }
  0xab   : > { %755 = vmatprep.subr.bf16.mxu0 %v1138_v25 }
  0xae   : > { %756 = vmatpush3.bf16.msra.mxu0 %v900_v39 }
  0xb1   : > { %758 = vmatmul.mubr.msk.bf16.vlgmr.msra.gmra.mrb[0].mxu0 %vm712_vm7, %v713_v42 }
  0xb2   : > { %982 = shalt.err (!%p979_p4)
}
  0xb3   : > { %s983_s29 = scalar_lea.hbm %s1441_s21, 128  ;;  %s987_s4 = scalar_lea.hbm %s1558_s5, 1024 }
  0xb4   : > { %p984_p9 = scmp.ne.s32.totalorder %s1441_s21, %s983_s29  ;;  %p988_p7 = scmp.lt.u32.totalorder %s1441_s21, %s1558_s5 }
  0xb5   : > { %p989_p10 = scmp.lt.u32.totalorder %s987_s4, %s983_s29  ;;  %p991_p0 = scmp.lt.u32.totalorder %s983_s29, %s1441_s21 }
  0xb6   : > { %p985_p13 = pnand %p984_p9, %p1596_p2 }
  0xb7   : > { %p990_p12 = por %p989_p10, %p988_p7 }
  0xb8   : > { %p986_p6 = pneg %p985_p13 }
  0xb9   : > { %p992_p3 = por %p991_p0, %p990_p12 }
  0xbb   : > { %p993_p5 = pnand %p992_p3, %p986_p6 }
  0xbd   : > { %996 = shalt.err (!%p993_p5)
}
  0xbe   : > { %s1141_s24 = smov 64   ;;  %s1142_s12 = smov 4   ;;  %v702_v45 = vld [vmem:[%s303_s25] ss:$0 sm:$0xff] }
  0xbf   : > { %770 = dma.vmem_to_hbm [thread:$0]  (%p1596_p2), %s1443_s26, 128, %s1441_s21, %s509_s17, %s1141_s24, %s1141_s24, %s1142_s12  }
  0xc0   : > { %s1597_s10 = sld [smem:[#allocation25_spill]]  ;;  %s722_s7 = sshll.u32 %s1433_s23, 7 }
  0xc1   : > { %s547_s26 = sshll.u32 %s1406_s30, 4  ;;  %s1598_s25 = sld [smem:[#allocation26_spill]]  ;;  %s1489_s26 = int_to_ptr.vmem [resolvable:$true] %s547_s26 }
  0xc2   : > { %s514_s23 = scalar_lea.sflag [#allocation13], %s1387_s6  ;;  %s997_s4 = scalar_lea.vmem %s1489_s26, 256 }
  0xc3   : > { %p998_p8 = scmp.ne.s32.totalorder %s1489_s26, %s997_s4  ;;  %s1143_s27 = smov [#allocation12]  }
  0xc4   : > { %s1001_s28 = sshll.u32 %s1143_s27, 4  ;;  %s1002_s28 = int_to_ptr.vmem [resolvable:$false] %s1001_s28 }
  0xc5   : > { %p999_p11 = pnand %p998_p8, %p1596_p2  ;;  %s1003_s24 = scalar_lea.vmem %s1002_s28, 512 }
  0xc6   : > { %v703_v46 = vld [vmem:[%s1597_s10] ss:$0 sm:$0xff]  ;;  %p1004_p4 = scmp.lt.s32.totalorder %s1489_s26, %s1002_s28  ;;  %p1005_p9 = scmp.lt.s32.totalorder %s1003_s24, %s997_s4 }
  0xc7   : > { %v415_v47 = vsel %vm1414_vm5, %v702_v45, %v703_v46  ;;  %v416_v49 = vsel %vm1421_vm6, %v702_v45, %v703_v46  ;;  %s1486_s17 = scalar_lea.hbm %s1598_s25, %s722_s7  ;;  %p1000_p1 = pneg %p999_p11 }
  0xc8   : > { %p1006_p13 = por %p1005_p9, %p1004_p4 }
  0xca   : > { %p1007_p6 = pnand %p1006_p13, %p1000_p1 }
 0x184   : > { %v499_v48 = vpop.f32.mrb[0].mxu0 }
 0x185   : > { %v500_v50 = vadd.f32 %v499_v48, %v415_v47  ;;  %v759_v51 = vpop.f32.mrb[1].mxu0 }
 0x186   : > { %v502_v52 = vpop.f32.mrb[2].mxu0 }
 0x187   : > { %506 = vst [vmem:[%s1406_s30] sm:$0xff] %v500_v50  ;;  %v503_v53 = vadd.f32 %v502_v52, %v416_v49  ;;  %v760_v54 = vpop.f32.mrb[3].mxu0 }
 0x189   : > { %507 = vst [vmem:[%s1406_s30 + $0x8] sm:$0xff] %v503_v53 }
 0x18a   : > { %1010 = shalt.err (!%p1007_p6)
}
 0x18b   : > { %s1011_s30 = scalar_lea.hbm %s1486_s17, 256  ;;  %s1015_s19 = scalar_lea.hbm %s1598_s25, 2048 }
 0x18c   : > { %p1012_p7 = scmp.ne.s32.totalorder %s1486_s17, %s1011_s30  ;;  %p1016_p0 = scmp.lt.u32.totalorder %s1486_s17, %s1598_s25 }
 0x18d   : > { %p1017_p3 = scmp.lt.u32.totalorder %s1015_s19, %s1011_s30  ;;  %p1019_p8 = scmp.lt.u32.totalorder %s1011_s30, %s1486_s17 }
 0x18e   : > { %p1013_p10 = pnand %p1012_p7, %p1596_p2 }
 0x18f   : > { %p1018_p5 = por %p1017_p3, %p1016_p0 }
 0x190   : > { %p1014_p12 = pneg %p1013_p10 }
 0x191   : > { %p1020_p11 = por %p1019_p8, %p1018_p5 }
 0x193   : > { %p1021_p1 = pnand %p1020_p11, %p1014_p12 }
 0x195   : > { %1024 = shalt.err (!%p1021_p1)
}
 0x196   : > { %s1144_s10 = smov 128   ;;  %s1145_s7 = smov 8  }
 0x197   : > { %771 = dma.vmem_to_hbm [thread:$0]  (%p1596_p2), %s1489_s26, 256, %s1486_s17, %s514_s23, %s1144_s10, %s1144_s10, %s1145_s7  }
 0x198 PF: > { %s1599_s18 = sld [smem:[#allocation19_spill]]  ;;  %s1600_s21 = sld [smem:[#allocation21_spill]] }
 0x199   : > { %p792_p4 = scmp.ge.s32.totalorder %s1129_s16, 2 }
 0x19e   : > { %s562_s4 = sand.u32 1, %s1599_s18   ;;  %p1601_p9 = scmp.ne.s32.totalorder %s1600_s21, 0 }
 0x19f   : > { %s563_s27 = scalar_lea.sflag [#allocation8], %s562_s4 }
 0x1a0   : > { %p783_p13 = pnand %p792_p4, %p1601_p9 }
 0x1a2   : > { %1080 = dma.done.wait (!%p783_p13), %s563_s27, 128  }
 0x1a3   : > { %1082 = vsyncadd (!%p783_p13), %s563_s27, 4294967168  ;;  %s572_s28 = scalar_lea.sflag [#allocation13], %s562_s4 }
 0x1a4   : > { %1084 = dma.done.wait (!%p783_p13), %s572_s28, 256  }
 0x1a5   : > { %1086 = vsyncadd (!%p783_p13), %s572_s28, 4294967040  ;;  %s31_s16 = sadd.s32 1, %s1129_s16   ;;  %s1602_s12 = sld [smem:[#allocation20_spill]] }
 0x1a6   : > { %p28_p6 = scmp.ge.s32.totalorder %s31_s16, 10   ;;  %s1603_s22 = sld [smem:[#allocation22_spill]] }
 0x1a7   : > { %s1604_s6 = sld [smem:[#allocation23_spill]]  ;;  %s1605_s7 = smov %s1093_s8 }
 0x1a8   : > { %s1606_s8 = smov %s1097_s9  ;;  %s1607_s9 = smov %s1330_s14 }
 0x1a9   : > { %s1608_s10 = smov %s1105_s11  ;;  %s1609_s11 = smov %s1109_s0 }
 0x1aa   : > { %s1610_s0 = smov %s1325_s2  ;;  %s1611_s13 = smov %s1125_s15 }
 0x1ab   :  { %30 = sbr.rel (!%p28_p6) target bundleno = 25 (0x19), region = 113 }
 0x1ac   : > { %s1612_s14 = smov %s1603_s22 }
 0x1ad   : > { %s1613_s15 = smov %s1604_s6 }
 0x1b2   :  { %577 = vsyncpa [#allocation7], 1 }
 0x1b3   :  { %579 = vsyncpa [#allocation7 + $0x1], 1 }
 0x1b4   :  { %580 = vsyncpa [#allocation10], 1 }
 0x1b5   :  { %581 = vsyncpa [#allocation8], 1 }
 0x1b6   :  { %583 = vsyncpa [#allocation8 + $0x1], 1 }
 0x1b7   :  { %584 = vsyncpa [#allocation13], 1 }
 0x1b8   :  { %586 = vsyncpa [#allocation13 + $0x1], 1 }

</bundles_post_ra>
